<compile_context>
chip_gen: v7x
topology: tpu7x:2x2x1
jax: 0.10.0
libtpu: 0.0.40
codegen_flags: <defaults>
</compile_context>

<pallas_src>
import math

import jax
import jax.numpy as jnp
from jax import lax
from jax.experimental import pallas as pl
from jax.experimental.pallas import tpu as pltpu

LN_EPS = 1e-5  # torch.nn.LayerNorm default eps


def _round_up(x, m):
    return (x + m - 1) // m * m


def linear_layernorm_kernel(x_ref, w_ref, p_ref, o_ref):
    # x_ref: (TM, H) input dtype      w_ref: (H, H) bf16 (resident, 1 buffer)
    # p_ref: (3, H) f32 = [bias; gamma; beta] (resident)    o_ref: (TM, H)
    x = x_ref[...].astype(w_ref.dtype)        # VPU cast, hidden under MXU work
    y = jnp.dot(x, w_ref[...], preferred_element_type=jnp.float32)
    y = y + p_ref[0:1, :]                     # bias add in f32

    # LayerNorm over the hidden (lane) dim.  One pass: var = E[y^2] - mean^2,
    # so the two XLU reductions issue back-to-back without waiting on
    # `y - mean` (VPU), f32 throughout.
    h_inv = 1.0 / y.shape[-1]
    mean = jnp.sum(y, axis=-1, keepdims=True) * h_inv
    ex2 = jnp.sum(y * y, axis=-1, keepdims=True) * h_inv
    var = jnp.maximum(ex2 - mean * mean, 0.0)
    inv = lax.rsqrt(var + LN_EPS)
    o_ref[...] = ((y - mean) * inv * p_ref[1:2, :] + p_ref[2:3, :]).astype(o_ref.dtype)


def _vmem_capacity_bytes():
    try:
        return int(pltpu.get_tpu_info().vmem_capacity_bytes)
    except Exception:
        return 64 * 1024 * 1024  # conservative fallback = v7x per-core VMEM


def _choose_tile_rows(T, H, block_rows, vmem_cap, in_itemsize):
    """Pick the token-tile height and the (possibly padded) total row count."""
    # At least two row tiles so the "parallel" axis can shard across v7x's two
    # TensorCores; for large T this is simply block_rows.
    target = min(block_rows, max(8, _round_up((T + 1) // 2, 8)))

    # VMEM budget: resident bf16 W (single-buffered) + fused params, plus per
    # row: double-buffered in/out tiles and ~3 f32 (tm, H) intermediates
    # (matmul result / cast / LayerNorm temporaries).
    resident = H * H * 2 + 3 * H * 4
    per_row = (2 * in_itemsize + 2 * in_itemsize + 3 * 4) * H
    budget = int(0.6 * vmem_cap) - resident
    if budget > 0:
        target = min(target, max(8, (budget // per_row) // 8 * 8))
    target = max(8, target - target % 8)
    # TODO(synk): for H large enough that the resident bf16 (H, H) weight alone
    # blows the VMEM budget (H >= ~4K on v7x), switch to a K-streamed matmul
    # stage (grid axis over K, f32 (tm, H) acc scratch, pl.when init/finalize)
    # before the LayerNorm instead of keeping W resident.

    # Prefer a tile height that divides T exactly -> no jnp.pad HBM round-trip.
    if T % 8 == 0:
        best = 0
        cand = 8
        while cand <= target:
            if T % cand == 0:
                best = cand
            cand += 8
        if best >= max(8, target // 4):
            return best, T
    return target, _round_up(T, target)


def layernorm_of_linear(x, w, b, gamma, beta, *, block_rows=512):
    """Forward of LayerNorm(config, fn=Linear(H, H)): norm(fn(x)).

    x: (B, S, H);  w: (H, H);  b, gamma, beta: (H,).
    """
    B, S, H = x.shape
    T = B * S
    in_itemsize = jnp.dtype(x.dtype).itemsize

    vmem_cap = _vmem_capacity_bytes()
    tm, t_pad = _choose_tile_rows(T, H, block_rows, vmem_cap, in_itemsize)

    x2 = x.reshape(T, H)
    if t_pad != T:
        x2 = jnp.pad(x2, ((0, t_pad - T), (0, 0)))

    # bf16 weight: cast once here (not per grid step); accumulation stays f32.
    w_bf16 = w.astype(jnp.bfloat16)
    # Fuse bias / gamma / beta into one resident (3, H) f32 slab (single DMA).
    params = jnp.stack([b, gamma, beta]).astype(jnp.float32)

    grid = (t_pad // tm,)

    # VMEM accounting (incl. f32 intermediates); scoped limit stays below the
    # physical capacity of the current generation minus an 8 MiB margin.
    vmem_need = (H * H * 2 + 3 * H * 4
                 + 2 * tm * H * in_itemsize      # x tile, double-buffered
                 + 2 * tm * H * in_itemsize      # out tile, double-buffered
                 + 3 * tm * H * 4)               # f32 matmul/LN temporaries
    vmem_limit = int(min(max(2 * vmem_need, 32 * 1024 * 1024),
                         vmem_cap - 8 * 1024 * 1024))

    cost = pl.CostEstimate(
        flops=2 * t_pad * H * H + 10 * t_pad * H,
        transcendentals=t_pad,                               # one rsqrt per row
        bytes_accessed=2 * t_pad * H * in_itemsize + H * H * 2 + 3 * H * 4,
    )

    out = pl.pallas_call(
        linear_layernorm_kernel,
        out_shape=jax.ShapeDtypeStruct((t_pad, H), x.dtype),
        grid_spec=pltpu.PrefetchScalarGridSpec(
            num_scalar_prefetch=0,
            grid=grid,
            in_specs=[
                # x: tiled over tokens, default double-buffered pipeline.
                pl.BlockSpec((tm, H), lambda i: (i, 0)),
                # W and params are grid-invariant: keep a single VMEM buffer.
                pl.BlockSpec((H, H), lambda i: (0, 0),
                             pipeline_mode=pl.Buffered(1)),
                pl.BlockSpec((3, H), lambda i: (0, 0),
                             pipeline_mode=pl.Buffered(1)),
            ],
            out_specs=pl.BlockSpec((tm, H), lambda i: (i, 0)),
        ),
        compiler_params=pltpu.CompilerParams(
            dimension_semantics=("parallel",),   # row tiles are independent
            vmem_limit_bytes=vmem_limit,
        ),
        cost_estimate=cost,
    )(x2, w_bf16, params)

    if t_pad != T:
        out = out[:T]
    return out.reshape(B, S, H)


if __name__ == "__main__":
    # Small, lane-dense shapes: hidden is a multiple of 128 so stores are
    # unmasked full-lane vst; T = 16 rows -> two 8-row tiles (keeps both v7x
    # TensorCores busy, no-op on v5e/v6e).
    B, S, H = 2, 8, 128
    key = jax.random.PRNGKey(0)
    kx, kw, kb, kg, kbe = jax.random.split(key, 5)

    x = jax.random.normal(kx, (B, S, H), dtype=jnp.float32)
    # deterministic init for the wrapped fn (a Linear layer), matching
    # nn.Linear's uniform(-1/sqrt(H), 1/sqrt(H)) convention
    bound = 1.0 / math.sqrt(H)
    w = jax.random.uniform(kw, (H, H), minval=-bound, maxval=bound, dtype=jnp.float32)
    b = jax.random.uniform(kb, (H,), minval=-bound, maxval=bound, dtype=jnp.float32)
    # nn.LayerNorm affine params (perturbed from default ones/zeros so the
    # gamma/beta path is actually exercised)
    gamma = 1.0 + 0.05 * jax.random.normal(kg, (H,), dtype=jnp.float32)
    beta = 0.05 * jax.random.normal(kbe, (H,), dtype=jnp.float32)

    out = layernorm_of_linear(x, w, b, gamma, beta)
    jax.block_until_ready(out)

    # Matched-precision reference: same bf16 operands / f32 accumulation for
    # the Linear, f32 LayerNorm (torch semantics: biased var, eps inside rsqrt).
    y = jnp.einsum("bsh,hk->bsk",
                   x.astype(jnp.bfloat16), w.astype(jnp.bfloat16),
                   preferred_element_type=jnp.float32) + b
    mu = jnp.mean(y, axis=-1, keepdims=True)
    var = jnp.mean((y - mu) ** 2, axis=-1, keepdims=True)
    ref = (y - mu) * lax.rsqrt(var + LN_EPS) * gamma + beta

    assert out.shape == (B, S, H)
    err = float(jnp.max(jnp.abs(out - ref)))
    assert jnp.allclose(out, ref, atol=2e-3, rtol=2e-3), err
    print("KERNEL_OK")
</pallas_src>

<mosaic_0001>
module attributes {stable_mosaic.version = 11 : i64} {
  func.func @linear_layernorm_kernel(%arg0: i32, %arg1: memref<8x128xf32, #tpu.memory_space<vmem>>, %arg2: memref<128x128xbf16, #tpu.memory_space<vmem>>, %arg3: memref<3x128xf32, #tpu.memory_space<vmem>>, %arg4: memref<8x128xf32, #tpu.memory_space<vmem>>) attributes {dimension_semantics = [#tpu.dimension_semantics<parallel>], iteration_bounds = array<i64: 2>, scalar_prefetch = 0 : i64, scratch_operands = 0 : i64, tpu.core_type = #tpu.core_type<tc>, window_params = [{transform_indices = @transform_0, window_bounds = array<i64: 8, 128>}, {pipeline_mode = #tpu.pipeline_mode<synchronous>, transform_indices = @transform_1, window_bounds = array<i64: 128, 128>}, {pipeline_mode = #tpu.pipeline_mode<synchronous>, transform_indices = @transform_2, window_bounds = array<i64: 3, 128>}, {transform_indices = @transform_3, window_bounds = array<i64: 8, 128>}]} {
    %c0 = arith.constant 0 : index
    %c0_0 = arith.constant 0 : index
    %0 = vector.load %arg1[%c0, %c0_0] : memref<8x128xf32, #tpu.memory_space<vmem>>, vector<8x128xf32>
    %1 = arith.truncf %0 : vector<8x128xf32> to vector<8x128xbf16>
    %c0_1 = arith.constant 0 : index
    %c0_2 = arith.constant 0 : index
    %2 = vector.load %arg2[%c0_1, %c0_2] : memref<128x128xbf16, #tpu.memory_space<vmem>>, vector<128x128xbf16>
    %cst = arith.constant dense<0.000000e+00> : vector<8x128xf32>
    %3 = tpu.matmul %1, %2, %cst {dimension_numbers = #tpu.dot_dimension_numbers<[1], [0], [0], [1], [0, 0, 1, 1], [], []>} : vector<8x128xbf16>, vector<128x128xbf16>, vector<8x128xf32> -> vector<8x128xf32>
    %c0_3 = arith.constant 0 : index
    %c0_4 = arith.constant 0 : index
    %4 = vector.load %arg3[%c0_3, %c0_4] : memref<3x128xf32, #tpu.memory_space<vmem>>, vector<1x128xf32>
    %5 = vector.broadcast %4 : vector<1x128xf32> to vector<8x128xf32>
    %6 = arith.addf %3, %5 : vector<8x128xf32>
    %cst_5 = arith.constant dense<0.000000e+00> : vector<8xf32>
    %7 = vector.multi_reduction <add>, %6, %cst_5 [1] : vector<8x128xf32> to vector<8xf32>
    %8 = vector.shape_cast %7 : vector<8xf32> to vector<8x1xf32>
    %cst_6 = arith.constant 7.812500e-03 : f32
    %9 = vector.broadcast %cst_6 : f32 to vector<8x1xf32>
    %10 = arith.mulf %8, %9 : vector<8x1xf32>
    %11 = arith.mulf %6, %6 : vector<8x128xf32>
    %cst_7 = arith.constant dense<0.000000e+00> : vector<8xf32>
    %12 = vector.multi_reduction <add>, %11, %cst_7 [1] : vector<8x128xf32> to vector<8xf32>
    %13 = vector.shape_cast %12 : vector<8xf32> to vector<8x1xf32>
    %cst_8 = arith.constant 7.812500e-03 : f32
    %14 = vector.broadcast %cst_8 : f32 to vector<8x1xf32>
    %15 = arith.mulf %13, %14 : vector<8x1xf32>
    %16 = arith.mulf %10, %10 : vector<8x1xf32>
    %17 = arith.subf %15, %16 : vector<8x1xf32>
    %cst_9 = arith.constant 0.000000e+00 : f32
    %18 = vector.broadcast %cst_9 : f32 to vector<8x1xf32>
    %19 = arith.maximumf %17, %18 : vector<8x1xf32>
    %cst_10 = arith.constant 9.99999974E-6 : f32
    %20 = vector.broadcast %cst_10 : f32 to vector<8x1xf32>
    %21 = arith.addf %19, %20 : vector<8x1xf32>
    %22 = math.rsqrt %21 : vector<8x1xf32>
    %23 = vector.broadcast %10 : vector<8x1xf32> to vector<8x128xf32>
    %24 = arith.subf %6, %23 : vector<8x128xf32>
    %25 = vector.broadcast %22 : vector<8x1xf32> to vector<8x128xf32>
    %26 = arith.mulf %24, %25 : vector<8x128xf32>
    %c1 = arith.constant 1 : index
    %c0_11 = arith.constant 0 : index
    %27 = vector.load %arg3[%c1, %c0_11] : memref<3x128xf32, #tpu.memory_space<vmem>>, vector<1x128xf32>
    %28 = vector.broadcast %27 : vector<1x128xf32> to vector<8x128xf32>
    %29 = arith.mulf %26, %28 : vector<8x128xf32>
    %c2 = arith.constant 2 : index
    %c0_12 = arith.constant 0 : index
    %30 = vector.load %arg3[%c2, %c0_12] : memref<3x128xf32, #tpu.memory_space<vmem>>, vector<1x128xf32>
    %31 = vector.broadcast %30 : vector<1x128xf32> to vector<8x128xf32>
    %32 = arith.addf %29, %31 : vector<8x128xf32>
    %c0_13 = arith.constant 0 : index
    %c0_14 = arith.constant 0 : index
    %33 = vector.load %arg4[%c0_13, %c0_14] : memref<8x128xf32, #tpu.memory_space<vmem>>, vector<8x128xf32>
    tpu.vector_store %arg4[%c0_13, %c0_14], %32 {strides = array<i32>} : memref<8x128xf32, #tpu.memory_space<vmem>>, vector<8x128xf32>,
    return
  }
  func.func @transform_0(%arg0: i32) -> (i32, i32) {
    %c0_i32 = arith.constant 0 : i32
    %c0_i32_0 = arith.constant 0 : i32
    return %arg0, %c0_i32 : i32, i32
  }
  func.func @transform_1(%arg0: i32) -> (i32, i32) {
    %c0_i32 = arith.constant 0 : i32
    %c0_i32_0 = arith.constant 0 : i32
    %c0_i32_1 = arith.constant 0 : i32
    return %c0_i32, %c0_i32_0 : i32, i32
  }
  func.func @transform_2(%arg0: i32) -> (i32, i32) {
    %c0_i32 = arith.constant 0 : i32
    %c0_i32_0 = arith.constant 0 : i32
    %c0_i32_1 = arith.constant 0 : i32
    return %c0_i32, %c0_i32_0 : i32, i32
  }
  func.func @transform_3(%arg0: i32) -> (i32, i32) {
    %c0_i32 = arith.constant 0 : i32
    %c0_i32_0 = arith.constant 0 : i32
    return %arg0, %c0_i32 : i32, i32
  }
}

</mosaic_0001>

<bundles_post_ra>
// kernel: tpu_custom_call.1
= control target key start
LH: loop header
LB: loop body
LE: loop exit
PB: predicated region body
PF: predicated region fallthrough
CT: control target
= control target key end

     0   :  { %8 = vsyncpa [#allocation3], 0  ;;  %s925_s0 = inlined_call_operand.hbm [shape: f32[16,128], index: 0, kind: input, shape index: {}]   ;;  %s926_s1 = inlined_call_operand.hbm [shape: bf16[128,128], index: 1, kind: input, shape index: {}]   ;;  %s927_s2 = inlined_call_operand.vmem [shape: f32[3,128], index: 2, kind: input, shape index: {}]   ;;  %s928_s3 = inlined_call_operand.hbm [shape: f32[16,128], index: 3, kind: output, shape index: {}]  }
   0x1   :  { %10 = vsyncpa [#allocation3 + $0x1], 0 }
   0x2   :  { %11 = vsyncpa [#allocation6], 0 }
   0x3   :  { %12 = vsyncpa [#allocation4], 0 }
   0x4   :  { %14 = vsyncpa [#allocation4 + $0x1], 0  ;;  %s716_s12 = smov 0   ;;  %s718_s13 = smov 0  }
   0x5   :  { %s720_s14 = smov 0   ;;  %s722_s15 = smov 0  }
   0x6 LB: > { %s737_s16 = sadd.s32 4294967295, %s687_s15   ;;  %s434_s17 = sadd.s32 4294967294, %s687_s15   ;;  %s687_s15 = sphi %s722_s15, %s948_s15   ;;  %s683_s14 = sphi %s720_s14, %s947_s14   ;;  %s679_s13 = sphi %s718_s13, %s946_s13   ;;  %s675_s12 = sphi %s716_s12, %s945_s12  }
   0x7   : > { %p40_p0 = scmp.ne.s32.totalorder %s679_s13, %s675_s12  ;;  %p929_p1 = scmp.eq.s32.totalorder %s737_s16, 0 }
   0x8   : > { %p112_p3 = scmp.eq.s32.totalorder %s434_s17, 1  ;;  %p435_p5 = scmp.ge.s32.totalorder %s687_s15, 1 }
   0x9   : > { %p746_p4 = por %p929_p1, %p40_p0  ;;  %p119_p7 = scmp.lt.s32.totalorder %s687_s15, 3 }
   0xa   : > { %p751_p6 = por %p112_p3, %p40_p0  ;;  %s689_s21 = smov [#allocation5]  }
   0xb   : > { %s932_s18 = scalar_select %p746_p4, 1, 0 }
   0xc   : > { %s933_s19 = scalar_select %p751_p6, 1, 0 }
   0xd   : > { %p756_p8 = pnand %p435_p5, %p119_p7  ;;  %s131_s22 = sshll.u32 %s689_s21, 4  ;;  %s760_s22 = int_to_ptr.vmem [resolvable:$true] %s131_s22 }
   0xe   : > { %s772_s24 = sadd.s32 1, %s687_s15   ;;  %s27_s25 = sadd.s32 1, %s683_s14 }
   0xf   : > { %s934_s20 = scalar_select %p756_p8, 1, 0 }
  0x10   : > { %p496_p9 = pneg %p756_p8  ;;  %s24_s26 = ssub.s32 %s687_s15, %s772_s24 }
  0x11   : > { %s559_s29 = scalar_lea.hbm %s926_s1, 1024 }
  0x12   : > { %p767_p11 = pnand %p496_p9, %p929_p1  ;;  %p560_p12 = scmp.ne.s32.totalorder %s926_s1, %s559_s29 }
  0x13   : > { %p566_p5 = scmp.lt.u32.totalorder %s559_s29, %s926_s1 }
  0x14   : > { %p561_p13 = pneg %p767_p11 }
  0x16   : > { %p562_p0 = pnand %p561_p13, %p560_p12 }
  0x18   : > { %p563_p3 = pneg %p562_p0 }
  0x1a   : > { %p568_p7 = pnand %p566_p5, %p563_p3 }
  0x1c   : > { %571 = shalt.err (!%p568_p7)
}
  0x1d   : > { %s572_s7 = scalar_lea.vmem %s760_s22, 1024  ;;  %p580_p2 = scmp.lt.s32.totalorder %s760_s22, %s760_s22 }
  0x1e   : > { %p573_p9 = scmp.ne.s32.totalorder %s760_s22, %s572_s7  ;;  %p581_p6 = scmp.lt.s32.totalorder %s572_s7, %s572_s7 }
  0x20   : > { %p575_p10 = pnand %p573_p9, %p561_p13  ;;  %p582_p4 = por %p581_p6, %p580_p2 }
  0x22   : > { %p576_p1 = pneg %p575_p10 }
  0x24   : > { %p583_p8 = pnand %p582_p4, %p576_p1 }
  0x26   : > { %586 = shalt.err (!%p583_p8)
}
  0x27   : > { %s690_s8 = smov 64   ;;  %s691_s9 = smov 4  }
  0x28   : > { %499 = dma.hbm_to_vmem [thread:$0]  (!%p767_p11), %s926_s1, 1024, %s760_s22, [#allocation6], %s690_s8, %s690_s8, %s691_s9  }
  0x29   : > { %p25_p2 = scmp.eq.s32.totalorder %s24_s26, 0  ;;  %p34_p1 = scmp.ne.s32.totalorder %s683_s14, %s679_s13 }
  0x2a   : > { %p35_p4 = scmp.eq.s32.totalorder %s687_s15, 0  ;;  %p509_p6 = scmp.lt.s32.totalorder %s687_s15, 2 }
  0x2b   : > { %s803_s17 = scalar_select %p25_p2, %s683_s14, %s27_s25  }
  0x2c   : > { %p36_p8 = por %p35_p4, %p34_p1  ;;  %p936_p10 = scmp.eq.s32.totalorder %s737_s16, 1 }
  0x2d   : > { %s148_s27 = sand.u32 1, %s683_s14   ;;  %s439_s28 = sshll.u32 %s687_s15, 7 }
  0x2e   : > { %p807_p12 = por %p936_p10, %p34_p1  ;;  %s438_s29 = sshll.u32 %s148_s27, 3 }
  0x2f   : > { %s816_s4 = scalar_lea.hbm %s925_s0, %s439_s28  ;;  %s152_s22 = scalar_lea.vmem [#allocation2], %s438_s29 }
  0x30   : > { %s159_s25 = sshll.u32 %s152_s22, 4  ;;  %p818_p11 = pnand %p509_p6, %p36_p8  ;;  %s822_s25 = int_to_ptr.vmem [resolvable:$true] %s159_s25 }
  0x31   : > { %s149_s5 = scalar_lea.sflag [#allocation3], %s148_s27  ;;  %s587_s6 = scalar_lea.hbm %s816_s4, 128 }
  0x32   : > { %p588_p13 = scmp.ne.s32.totalorder %s816_s4, %s587_s6  ;;  %p589_p0 = pneg %p818_p11 }
  0x33   : > { %s592_s9 = scalar_lea.hbm %s925_s0, 256  ;;  %p593_p7 = scmp.lt.u32.totalorder %s816_s4, %s925_s0 }
  0x34   : > { %p590_p3 = pnand %p589_p0, %p588_p13  ;;  %p594_p9 = scmp.lt.u32.totalorder %s592_s9, %s587_s6 }
  0x35   : > { %p596_p1 = scmp.lt.u32.totalorder %s587_s6, %s816_s4 }
  0x36   : > { %p591_p5 = pneg %p590_p3  ;;  %p595_p2 = por %p594_p9, %p593_p7 }
  0x38   : > { %p597_p4 = por %p596_p1, %p595_p2 }
  0x3a   : > { %p598_p6 = pnand %p597_p4, %p591_p5 }
  0x3c   : > { %601 = shalt.err (!%p598_p6)
}
  0x3d   : > { %s602_s27 = scalar_lea.vmem %s822_s25, 128  ;;  %s692_s28 = smov [#allocation2]  }
  0x3e   : > { %p603_p8 = scmp.ne.s32.totalorder %s822_s25, %s602_s27  ;;  %s607_s29 = sshll.u32 %s692_s28, 4  ;;  %s608_s29 = int_to_ptr.vmem [resolvable:$false] %s607_s29 }
  0x3f   : > { %s609_s23 = scalar_lea.vmem %s608_s29, 256  ;;  %p610_p3 = scmp.lt.s32.totalorder %s822_s25, %s608_s29 }
  0x40   : > { %p605_p10 = pnand %p603_p8, %p589_p0  ;;  %p611_p7 = scmp.lt.s32.totalorder %s609_s23, %s602_s27 }
  0x42   : > { %p606_p13 = pneg %p605_p10  ;;  %p612_p9 = por %p611_p7, %p610_p3 }
  0x44   : > { %p613_p2 = pnand %p612_p9, %p606_p13 }
  0x46   : > { %616 = shalt.err (!%p613_p2)
}
  0x47   : > { %503 = dma.hbm_to_vmem [thread:$0]  (!%p818_p11), %s816_s4, 128, %s822_s25, %s149_s5  }
  0x48   : > { %p939_p5 = scmp.ne.s32.totalorder %s934_s20, 0 }
  0x49   : > { %s852_s30 = sand.u32 (!%p939_p5), 1, %s679_s13   ;;  %p940_p0 = scmp.ne.s32.totalorder (!%p939_p5), %s932_s18, 0 }
  0x4a   : > { %168 = sbr.rel (%p939_p5) target bundleno = 517 (0x205), region = 32  ;;  %s441_s22 = sshll.u32 (!%p939_p5), %s852_s30, 3 }
  0x4b   : > { %s171_s6 = scalar_lea.sflag (!%p939_p5), [#allocation3], %s852_s30  ;;  %s174_s7 = scalar_lea.vmem (!%p939_p5), [#allocation2], %s441_s22 }
  0x51   : > { %662 = dma.done.wait (%p940_p0), %s171_s6, 128  }
  0x52   : > { %664 = vsyncadd (%p940_p0), %s171_s6, 4294967168  ;;  %p941_p11 = scmp.eq.s32.totalorder %s737_s16, 0 }
  0x54   : > { %666 = dma.done.wait (%p941_p11), [#allocation6], 1024   ;;  %p942_p1 = pmov %p941_p11 }
  0x55   : > { %v693_v0 = vmov 0.0   ;;  %vm694_vm0 = vmmov 0   ;;  %v549_v1 = vld [vmem:[#allocation5] sm:$0xff]   ;;  %v550_v2 = vld [vmem:[#allocation5 + $0x8] sm:$0xff]   ;;  %v551_v3 = vld [vmem:[#allocation5 + $0x10] sm:$0xff]   ;;  %s456_s8 = sshll.u32 %s737_s16, 7 }
  0x56   : > { %668 = vsyncadd (%p942_p1), [#allocation6], 4294966272  ;;  %468 = vmatprep.subr.bf16.mxu0 %v693_v0  ;;  %484 = vmatprep.mubr.msk.bf16.mxu0 %vm694_vm0, %v693_v0  ;;  %v552_v4 = vld [vmem:[#allocation5 + $0x18] sm:$0xff]   ;;  %v553_v5 = vld [vmem:[#allocation5 + $0x20] sm:$0xff]   ;;  %s200_s9 = scalar_lea.vmem [#allocation7], %s441_s22  ;;  %s881_s28 = scalar_lea.hbm %s928_s3, %s456_s8 }
  0x57   : > { %469 = vmatpush3.bf16.msra.mxu0 %v549_v1  ;;  %v554_v6 = vld [vmem:[#allocation5 + $0x28] sm:$0xff]   ;;  %v555_v7 = vld [vmem:[#allocation5 + $0x30] sm:$0xff]   ;;  %v556_v8 = vld [vmem:[#allocation5 + $0x38] sm:$0xff]   ;;  %s354_s10 = sshll.u32 %s200_s9, 4  ;;  %s341_s29 = scalar_lea.sflag [#allocation4], %s852_s30  ;;  %s883_s10 = int_to_ptr.vmem [resolvable:$true] %s354_s10 }
  0x58   : > { %470 = vmatprep.subr.bf16.mxu0 %v693_v0  ;;  %v202_v9 = vld [vmem:[%s174_s7] sm:$0xff]  ;;  %s617_s23 = scalar_lea.vmem %s883_s10, 128  ;;  %s695_s16 = smov [#allocation7]  }
  0x59   : > { %v203_v10 = vpack.c.bf16 %v202_v9, %v202_v9  ;;  %v444_v11 = vld [vmem:[%s927_s2] ss:$0 sm:$0xff]  ;;  %v453_v28 = vld [vmem:[%s927_s2 + $0x1] ss:$0 sm:$0xff]  ;;  %v454_v30 = vld [vmem:[%s927_s2 + $0x2] ss:$0 sm:$0xff]  ;;  %p618_p4 = scmp.ne.s32.totalorder %s883_s10, %s617_s23 }
  0x5a   : > { %s621_s22 = sshll.u32 %s695_s16, 4  ;;  %s622_s22 = int_to_ptr.vmem [resolvable:$false] %s621_s22 }
  0x5b   : > { %471 = vmatpush3.bf16.msra.mxu0 %v550_v2  ;;  %p619_p6 = pnand %p618_p4, %p807_p12  ;;  %s623_s6 = scalar_lea.vmem %s622_s22, 256 }
  0x5c   : > { %472 = vmatprep.subr.bf16.mxu0 %v693_v0  ;;  %p624_p10 = scmp.lt.s32.totalorder %s883_s10, %s622_s22  ;;  %p625_p13 = scmp.lt.s32.totalorder %s623_s6, %s617_s23 }
  0x5d   : > { %p620_p8 = pneg %p619_p6 }
  0x5e   : > { %p626_p3 = por %p625_p13, %p624_p10 }
  0x5f   : > { %473 = vmatpush3.bf16.msra.mxu0 %v551_v3 }
  0x60   : > { %474 = vmatprep.subr.bf16.mxu0 %v693_v0  ;;  %p627_p7 = pnand %p626_p3, %p620_p8 }
  0x63   : > { %475 = vmatpush3.bf16.msra.mxu0 %v552_v4 }
  0x64   : > { %476 = vmatprep.subr.bf16.mxu0 %v693_v0 }
  0x67   : > { %477 = vmatpush3.bf16.msra.mxu0 %v553_v5 }
  0x68   : > { %478 = vmatprep.subr.bf16.mxu0 %v693_v0 }
  0x6b   : > { %479 = vmatpush3.bf16.msra.mxu0 %v554_v6 }
  0x6c   : > { %480 = vmatprep.subr.bf16.mxu0 %v693_v0 }
  0x6f   : > { %481 = vmatpush3.bf16.msra.mxu0 %v555_v7 }
  0x70   : > { %482 = vmatprep.subr.bf16.mxu0 %v693_v0 }
  0x73   : > { %483 = vmatpush3.bf16.msra.mxu0 %v556_v8 }
  0x76   : > { %485 = vmatmul.mubr.bf16.vlgmr.msra.gmra.mrb[0].mxu0 %v203_v10 }
 0x149   : > { %v307_v12 = vpop.f32.mrb[0].mxu0 }
 0x14a   : > { %v308_v13 = vadd.f32 %v444_v11, %v307_v12  ;;  %v486_v14 = vpop.f32.mrb[1].mxu0 }
 0x14b   : > { %v310_v15 = vpop.f32.mrb[2].mxu0 }
 0x14c   : > { %313 = vadd.xlane.f32.xlu0 %v308_v13  ;;  %v487_v16 = vpop.f32.mrb[3].mxu0  ;;  %v316_v17 = vmul.f32 %v308_v13, %v308_v13 }
 0x150   : > { %317 = vadd.xlane.f32.xlu0 %v316_v17 }
 0x1d9   : > { %v314_v18 = vpop.xlane.xlu0 %313 }
 0x1da   : > { %v315_v19 = vmul.f32 0.0078125, %v314_v18 }
 0x1dc   : > { %v320_v21 = vmul.f32 %v315_v19, %v315_v19  ;;  %v325_v26 = vsub.f32 %v308_v13, %v315_v19 }
 0x1dd   : > { %v318_v20 = vpop.xlane.xlu0 %317 }
 0x1de   : > { %v319_v22 = vmul.f32 0.0078125, %v318_v20 }
 0x1e0   : > { %v321_v23 = vsub.f32 %v319_v22, %v320_v21 }
 0x1e2   : > { %v322_v24 = vmax.f32 %v321_v23, 0.0 }
 0x1e4   : > { %v323_v25 = vadd.f32 1e-05, %v322_v24 }
 0x1e6   : > { %557 = vrsqrt.f32 %v323_v25 }
 0x1f0   : > { %v558_v27 = vpop.eup %557 }
 0x1f1   : > { %v326_v29 = vmul.f32 %v558_v27, %v325_v26 }
 0x1f3   : > { %v332_v31 = vmul.f32 %v453_v28, %v326_v29 }
 0x1f5   : > { %v338_v32 = vadd.f32 %v454_v30, %v332_v31 }
 0x1f7   : > { %339 = vst [vmem:[%s200_s9] sm:$0xff] %v338_v32 }
 0x1f8   : > { %630 = shalt.err (!%p627_p7)
}
 0x1f9   : > { %s631_s30 = scalar_lea.hbm %s881_s28, 128  ;;  %s635_s20 = scalar_lea.hbm %s928_s3, 256 }
 0x1fa   : > { %p632_p9 = scmp.ne.s32.totalorder %s881_s28, %s631_s30  ;;  %p636_p0 = scmp.lt.u32.totalorder %s881_s28, %s928_s3 }
 0x1fb   : > { %p637_p11 = scmp.lt.u32.totalorder %s635_s20, %s631_s30  ;;  %p639_p4 = scmp.lt.u32.totalorder %s631_s30, %s881_s28 }
 0x1fc   : > { %p633_p2 = pnand %p632_p9, %p807_p12 }
 0x1fd   : > { %p638_p1 = por %p637_p11, %p636_p0 }
 0x1fe   : > { %p634_p5 = pneg %p633_p2 }
 0x1ff   : > { %p640_p6 = por %p639_p4, %p638_p1 }
 0x201   : > { %p641_p8 = pnand %p640_p6, %p634_p5 }
 0x203   : > { %644 = shalt.err (!%p641_p8)
}
 0x204   : > { %494 = dma.vmem_to_hbm [thread:$0]  (%p807_p12), %s883_s10, 128, %s881_s28, %s341_s29  }
 0x205 PF: > { %s366_s26 = sand.u32 1, %s675_s12   ;;  %p943_p10 = scmp.ne.s32.totalorder %s933_s19, 0 }
 0x206   : > { %p944_p13 = scmp.ge.s32.totalorder %s687_s15, 2  ;;  %s367_s5 = scalar_lea.sflag [#allocation4], %s366_s26 }
 0x208   : > { %p505_p3 = pnand %p944_p13, %p943_p10 }
 0x20a   : > { %670 = dma.done.wait (!%p505_p3), %s367_s5, 128  }
 0x20b   : > { %672 = vsyncadd (!%p505_p3), %s367_s5, 4294967168  ;;  %p17_p7 = scmp.ge.s32.totalorder %s772_s24, 4   ;;  %s945_s12 = smov %s679_s13 }
 0x20c   : > { %s946_s13 = smov %s683_s14  ;;  %s947_s14 = smov %s803_s17 }
 0x20d   : > { %s948_s15 = smov %s772_s24  ;;  %19 = sbr.rel (!%p17_p7) target bundleno = 6 (0x6), region = 81 }
 0x214   :  { %372 = vsyncpa [#allocation3], 1 }
 0x215   :  { %374 = vsyncpa [#allocation3 + $0x1], 1 }
 0x216   :  { %375 = vsyncpa [#allocation6], 1 }
 0x217   :  { %376 = vsyncpa [#allocation4], 1 }
 0x218   :  { %378 = vsyncpa [#allocation4 + $0x1], 1 }

</bundles_post_ra>
